<compile_context>
chip_gen: v7x
topology: tpu7x:2x2x1
jax: 0.10.0
libtpu: 0.0.40
codegen_flags: <defaults>
</compile_context>

<pallas_src>
import numpy as np
import jax
import jax.numpy as jnp
from jax.experimental import pallas as pl
from jax.experimental.pallas import tpu as pltpu


# ----------------------------------------------------------------------------
# Fused kernel: per-(batch, q-tile, head) projection + attention + fc accumulate
# ----------------------------------------------------------------------------
def _make_mha_kernel(*, inv_temperature, approx_softmax, return_attn):
    def kernel(q_ref, k_ref, v_ref,
               wq_ref, bq_ref, wk_ref, bk_ref, wv_ref, bv_ref,
               fcw_ref, fcb_ref,
               out_ref, *maybe_attn):
        # Block shapes (grid = (sz_b, n_qt, n_head)):
        #   q_ref  : (1, TQ, d_model)        k_ref/v_ref : (1, len_k, d_model)
        #   wq_ref : (n_head, d_model, d_k)  bq_ref      : (n_head, 1, d_k)
        #   wv_ref : (n_head, d_model, d_v)  fcw_ref     : (n_head, d_v, d_out_pad)
        #   fcb_ref: (1, d_out_pad)
        #   out_ref: (1, TQ, d_out_pad)      attn_ref    : (1, 1, TQ, len_k)
        attn_ref = maybe_attn[0] if return_attn else None
        h = pl.program_id(2)
        cdt = q_ref.dtype        # MXU operand dtype (bf16 default / f32 exact)

        q = q_ref[0]             # (TQ, d_model)
        k = k_ref[0]             # (len_k, d_model)
        v = v_ref[0]             # (len_k, d_model)

        # Per-head weights via leading-axis dynamic index (no lane slicing).
        wq = wq_ref[h]           # (d_model, d_k)
        wk = wk_ref[h]
        wv = wv_ref[h]           # (d_model, d_v)
        fcw = fcw_ref[h]         # (d_v, d_out_pad)

        # Per-head projections: f32 accumulation on the MXU, f32 bias add.
        qh = jnp.dot(q, wq, preferred_element_type=jnp.float32) + bq_ref[h]
        kh = jnp.dot(k, wk, preferred_element_type=jnp.float32) + bk_ref[h]
        vh = jnp.dot(v, wv, preferred_element_type=jnp.float32) + bv_ref[h]

        # q @ k^T as a feature-axis contraction (no in-kernel transpose);
        # 1/temperature folded into a scalar mul; softmax in f32.
        s = jnp.einsum("qd,kd->qk", qh.astype(cdt), kh.astype(cdt),
                       preferred_element_type=jnp.float32) * inv_temperature
        s = s - jnp.max(s, axis=-1, keepdims=True)
        e = jnp.exp(s)
        denom = jnp.sum(e, axis=-1, keepdims=True)

        if return_attn:
            # Returned attention map uses the exact divide (rows sum to 1).
            attn_ref[0, 0] = (e / denom).astype(attn_ref.dtype)

        if approx_softmax:
            attn_w = e * pl.reciprocal(denom, approx=True)   # divide -> EUP
        else:
            attn_w = e / denom

        head_out = jnp.dot(attn_w.astype(cdt), vh.astype(cdt),
                           preferred_element_type=jnp.float32)     # (TQ, d_v)

        # Fused fc: per-head slice of the fc weight accumulated into the
        # VMEM-resident output block (no concat, no extra HBM traffic).
        contrib = jnp.dot(head_out.astype(cdt), fcw,
                          preferred_element_type=jnp.float32)      # (TQ, d_out_pad)

        @pl.when(h == 0)
        def _init():
            out_ref[...] = jnp.zeros_like(out_ref)

        out_ref[0] = out_ref[0] + contrib

        @pl.when(h == pl.num_programs(2) - 1)
        def _finalize():
            out_ref[0] = out_ref[0] + fcb_ref[...]

    return kernel


# ----------------------------------------------------------------------------
# Wrapper
# ----------------------------------------------------------------------------
def _pick_q_tile(len_q, q_block_rows):
    if len_q <= q_block_rows:
        return len_q
    if q_block_rows % 8 == 0 and len_q % q_block_rows == 0:
        return q_block_rows
    return len_q   # TODO(synk): handle ragged q tails via masking.


def _nbytes(shape, dtype):
    return int(np.prod(shape)) * np.dtype(dtype).itemsize


def multi_head_attention(q, k, v, params, *, n_head, d_k, d_v,
                         compute_dtype=jnp.bfloat16, approx_softmax=True,
                         attn_dtype=jnp.bfloat16, return_attn=True,
                         q_block_rows=256):
    sz_b, len_q, d_model = q.shape
    _, len_k, _ = k.shape
    inv_temperature = float(1.0 / np.power(d_k, 0.5))
    cdt = compute_dtype

    tq = _pick_q_tile(len_q, q_block_rows)
    n_qt = len_q // tq
    d_out_pad = ((d_v + 127) // 128) * 128   # lane-dense output store

    # MXU operands in compute_dtype; biases (and softmax/accumulation) in f32.
    qc = q.astype(cdt)
    kc = k.astype(cdt)
    vc = v.astype(cdt)

    # Head-major weight layout: (n_head, d_model, d_k|d_v) so the per-head view
    # inside the kernel is a free leading-axis index (no lane slicing).
    wq_hm = jnp.transpose(params["w_qs_w"].reshape(n_head, d_k, d_model), (0, 2, 1)).astype(cdt)
    wk_hm = jnp.transpose(params["w_ks_w"].reshape(n_head, d_k, d_model), (0, 2, 1)).astype(cdt)
    wv_hm = jnp.transpose(params["w_vs_w"].reshape(n_head, d_v, d_model), (0, 2, 1)).astype(cdt)
    bq = params["w_qs_b"].reshape(n_head, 1, d_k).astype(jnp.float32)
    bk = params["w_ks_b"].reshape(n_head, 1, d_k).astype(jnp.float32)
    bv = params["w_vs_b"].reshape(n_head, 1, d_v).astype(jnp.float32)

    # fc weight split per head, output dim zero-padded to a 128-lane multiple.
    fcw_hm = params["fc_w"].T.reshape(n_head, d_v, d_v)
    fcb = params["fc_b"]
    if d_out_pad != d_v:
        fcw_hm = jnp.pad(fcw_hm, ((0, 0), (0, 0), (0, d_out_pad - d_v)))
        fcb = jnp.pad(fcb, (0, d_out_pad - d_v))
    fcw_hm = fcw_hm.astype(cdt)
    fcb = fcb.reshape(1, d_out_pad).astype(jnp.float32)

    kernel = _make_mha_kernel(inv_temperature=inv_temperature,
                              approx_softmax=approx_softmax,
                              return_attn=return_attn)

    in_specs = [
        pl.BlockSpec((1, tq, d_model), lambda b, qt, h: (b, qt, 0)),
        pl.BlockSpec((1, len_k, d_model), lambda b, qt, h: (b, 0, 0)),
        pl.BlockSpec((1, len_k, d_model), lambda b, qt, h: (b, 0, 0)),
        # Weights/biases: constant block index -> fetched once, VMEM-resident.
        pl.BlockSpec((n_head, d_model, d_k), lambda b, qt, h: (0, 0, 0)),
        pl.BlockSpec((n_head, 1, d_k), lambda b, qt, h: (0, 0, 0)),
        pl.BlockSpec((n_head, d_model, d_k), lambda b, qt, h: (0, 0, 0)),
        pl.BlockSpec((n_head, 1, d_k), lambda b, qt, h: (0, 0, 0)),
        pl.BlockSpec((n_head, d_model, d_v), lambda b, qt, h: (0, 0, 0)),
        pl.BlockSpec((n_head, 1, d_v), lambda b, qt, h: (0, 0, 0)),
        pl.BlockSpec((n_head, d_v, d_out_pad), lambda b, qt, h: (0, 0, 0)),
        pl.BlockSpec((1, d_out_pad), lambda b, qt, h: (0, 0)),
    ]
    out_specs = [pl.BlockSpec((1, tq, d_out_pad), lambda b, qt, h: (b, qt, 0))]
    out_shape = [jax.ShapeDtypeStruct((sz_b, len_q, d_out_pad), jnp.float32)]
    if return_attn:
        # Head-major so the reshape to (n_head*sz_b, len_q, len_k) is free.
        out_specs.append(pl.BlockSpec((1, 1, tq, len_k),
                                      lambda b, qt, h: (h, b, qt, 0)))
        out_shape.append(jax.ShapeDtypeStruct((n_head, sz_b, len_q, len_k),
                                              attn_dtype))

    # Per-generation scoped-VMEM budget derived from actual block sizes
    # (double-buffered blocks + f32 intermediates), floor 16 MiB, cap 56 MiB
    # to leave headroom under v7x's 64 MiB physical VMEM.
    blocks = 2 * (_nbytes((1, tq, d_model), cdt)
                  + 2 * _nbytes((1, len_k, d_model), cdt)
                  + _nbytes((1, tq, d_out_pad), np.float32))
    blocks += 2 * (2 * _nbytes((n_head, d_model, d_k), cdt)
                   + _nbytes((n_head, d_model, d_v), cdt)
                   + _nbytes((n_head, d_v, d_out_pad), cdt)
                   + 2 * _nbytes((n_head, 1, d_k), np.float32)
                   + _nbytes((n_head, 1, d_v), np.float32)
                   + _nbytes((1, d_out_pad), np.float32))
    if return_attn:
        blocks += 2 * _nbytes((1, 1, tq, len_k), attn_dtype)
    interm = 4 * (tq * d_k + len_k * (d_k + d_v) + 3 * tq * len_k + tq * d_out_pad)
    vmem_limit = int(min(max(2 * (blocks + interm) + (4 << 20), 16 << 20), 56 << 20))

    outs = pl.pallas_call(
        kernel,
        grid=(sz_b, n_qt, n_head),
        in_specs=in_specs,
        out_specs=out_specs,
        out_shape=out_shape,
        compiler_params=pltpu.CompilerParams(
            dimension_semantics=("parallel", "parallel", "arbitrary"),
            vmem_limit_bytes=vmem_limit),
    )(qc, kc, vc, wq_hm, bq, wk_hm, bk, wv_hm, bv, fcw_hm, fcb)

    output = outs[0][:, :, :d_v]       # strip lane padding
    if not return_attn:
        return output
    attn = outs[1].reshape(n_head * sz_b, len_q, len_k)
    return output, attn


# ----------------------------------------------------------------------------
# Pure-JAX reference (for correctness check)
# ----------------------------------------------------------------------------
def multi_head_attention_ref(q, k, v, params, *, n_head, d_k, d_v):
    sz_b, len_q, d_model = q.shape
    _, len_k, _ = k.shape
    temperature = np.power(d_k, 0.5)

    def lin(x, w, b):
        return x @ w.T + b

    qp = lin(q, params["w_qs_w"], params["w_qs_b"]).reshape(sz_b, len_q, n_head, d_k)
    kp = lin(k, params["w_ks_w"], params["w_ks_b"]).reshape(sz_b, len_k, n_head, d_k)
    vp = lin(v, params["w_vs_w"], params["w_vs_b"]).reshape(sz_b, len_k, n_head, d_v)

    qp = jnp.transpose(qp, (2, 0, 1, 3)).reshape(-1, len_q, d_k)
    kp = jnp.transpose(kp, (2, 0, 1, 3)).reshape(-1, len_k, d_k)
    vp = jnp.transpose(vp, (2, 0, 1, 3)).reshape(-1, len_k, d_v)

    s = jnp.einsum("bqd,bkd->bqk", qp, kp) / temperature
    attn = jax.nn.softmax(s, axis=2)
    o = jnp.einsum("bqk,bkd->bqd", attn, vp)

    o = o.reshape(n_head, sz_b, len_q, d_v)
    o = jnp.transpose(o, (1, 2, 0, 3)).reshape(sz_b, len_q, -1)
    o = lin(o, params["fc_w"], params["fc_b"])
    return o, attn


# ----------------------------------------------------------------------------
# Deterministic parameter init (mirrors the PyTorch __init__ distributions)
# ----------------------------------------------------------------------------
def init_params(key, n_head, d_model, d_k, d_v):
    ks = jax.random.split(key, 8)
    std_qk = np.sqrt(2.0 / (d_model + d_k))
    std_v = np.sqrt(2.0 / (d_model + d_v))
    bias_bound = 1.0 / np.sqrt(d_model)
    fc_std = np.sqrt(2.0 / (n_head * d_v + d_v))   # xavier_normal_
    fc_bias_bound = 1.0 / np.sqrt(n_head * d_v)

    params = {
        "w_qs_w": std_qk * jax.random.normal(ks[0], (n_head * d_k, d_model), jnp.float32),
        "w_qs_b": jax.random.uniform(ks[1], (n_head * d_k,), jnp.float32,
                                     -bias_bound, bias_bound),
        "w_ks_w": std_qk * jax.random.normal(ks[2], (n_head * d_k, d_model), jnp.float32),
        "w_ks_b": jax.random.uniform(ks[3], (n_head * d_k,), jnp.float32,
                                     -bias_bound, bias_bound),
        "w_vs_w": std_v * jax.random.normal(ks[4], (n_head * d_v, d_model), jnp.float32),
        "w_vs_b": jax.random.uniform(ks[5], (n_head * d_v,), jnp.float32,
                                     -bias_bound, bias_bound),
        "fc_w": fc_std * jax.random.normal(ks[6], (d_v, n_head * d_v), jnp.float32),
        "fc_b": jax.random.uniform(ks[7], (d_v,), jnp.float32,
                                   -fc_bias_bound, fc_bias_bound),
    }
    return params


if __name__ == "__main__":
    n_head, d_model, d_k, d_v = 4, 32, 8, 8
    sz_b, seq = 2, 8

    key = jax.random.PRNGKey(0)
    kq, kk, kv, kp = jax.random.split(key, 4)
    q = jax.random.normal(kq, (sz_b, seq, d_model), jnp.float32)
    k = jax.random.normal(kk, (sz_b, seq, d_model), jnp.float32)
    v = jax.random.normal(kv, (sz_b, seq, d_model), jnp.float32)
    params = init_params(kp, n_head, d_model, d_k, d_v)

    out_ref, attn_ref = multi_head_attention_ref(q, k, v, params,
                                                 n_head=n_head, d_k=d_k, d_v=d_v)

    # 1) Exact-semantics path: f32 MXU operands, exact softmax divide, f32 attn.
    out32, attn32 = multi_head_attention(
        q, k, v, params, n_head=n_head, d_k=d_k, d_v=d_v,
        compute_dtype=jnp.float32, approx_softmax=False, attn_dtype=jnp.float32)
    out32 = jax.block_until_ready(out32)
    attn32 = jax.block_until_ready(attn32)
    assert out32.shape == (sz_b, seq, d_v)
    assert attn32.shape == (n_head * sz_b, seq, seq)
    np.testing.assert_allclose(np.asarray(out32), np.asarray(out_ref),
                               rtol=2e-3, atol=2e-3)
    np.testing.assert_allclose(np.asarray(attn32), np.asarray(attn_ref),
                               rtol=2e-3, atol=2e-3)

    # 2) Fast path (default): bf16 MXU operands, EUP approx reciprocal, bf16 attn.
    out_bf, attn_bf = multi_head_attention(
        q, k, v, params, n_head=n_head, d_k=d_k, d_v=d_v)
    out_bf = jax.block_until_ready(out_bf)
    attn_bf = jax.block_until_ready(attn_bf)
    np.testing.assert_allclose(np.asarray(out_bf), np.asarray(out_ref),
                               rtol=5e-2, atol=5e-2)
    np.testing.assert_allclose(np.asarray(attn_bf, dtype=np.float32),
                               np.asarray(attn_ref), rtol=5e-2, atol=5e-2)

    # 3) return_attn=False fast path (skips the S^2 HBM write entirely).
    out_fast = multi_head_attention(
        q, k, v, params, n_head=n_head, d_k=d_k, d_v=d_v, return_attn=False)
    out_fast = jax.block_until_ready(out_fast)
    np.testing.assert_allclose(np.asarray(out_fast), np.asarray(out_ref),
                               rtol=5e-2, atol=5e-2)

    print("KERNEL_OK")
</pallas_src>

<mosaic_0001>
module attributes {stable_mosaic.version = 11 : i64} {
  func.func @kernel(%arg0: i32, %arg1: i32, %arg2: i32, %arg3: memref<1x8x32xf32, #tpu.memory_space<vmem>>, %arg4: memref<1x8x32xf32, #tpu.memory_space<vmem>>, %arg5: memref<1x8x32xf32, #tpu.memory_space<vmem>>, %arg6: memref<4x32x8xf32, #tpu.memory_space<vmem>>, %arg7: memref<4x1x8xf32, #tpu.memory_space<vmem>>, %arg8: memref<4x32x8xf32, #tpu.memory_space<vmem>>, %arg9: memref<4x1x8xf32, #tpu.memory_space<vmem>>, %arg10: memref<4x32x8xf32, #tpu.memory_space<vmem>>, %arg11: memref<4x1x8xf32, #tpu.memory_space<vmem>>, %arg12: memref<4x8x128xf32, #tpu.memory_space<vmem>>, %arg13: memref<1x128xf32, #tpu.memory_space<vmem>>, %arg14: memref<1x8x128xf32, #tpu.memory_space<vmem>>, %arg15: memref<1x1x8x8xf32, #tpu.memory_space<vmem>>) attributes {dimension_semantics = [#tpu.dimension_semantics<parallel>, #tpu.dimension_semantics<parallel>, #tpu.dimension_semantics<arbitrary>], iteration_bounds = array<i64: 2, 1, 4>, scalar_prefetch = 0 : i64, scratch_operands = 0 : i64, tpu.core_type = #tpu.core_type<tc>, window_params = [{transform_indices = @transform_0, window_bounds = array<i64: 1, 8, 32>}, {transform_indices = @transform_1, window_bounds = array<i64: 1, 8, 32>}, {transform_indices = @transform_2, window_bounds = array<i64: 1, 8, 32>}, {pipeline_mode = #tpu.pipeline_mode<synchronous>, transform_indices = @transform_3, window_bounds = array<i64: 4, 32, 8>}, {pipeline_mode = #tpu.pipeline_mode<synchronous>, transform_indices = @transform_4, window_bounds = array<i64: 4, 1, 8>}, {pipeline_mode = #tpu.pipeline_mode<synchronous>, transform_indices = @transform_5, window_bounds = array<i64: 4, 32, 8>}, {pipeline_mode = #tpu.pipeline_mode<synchronous>, transform_indices = @transform_6, window_bounds = array<i64: 4, 1, 8>}, {pipeline_mode = #tpu.pipeline_mode<synchronous>, transform_indices = @transform_7, window_bounds = array<i64: 4, 32, 8>}, {pipeline_mode = #tpu.pipeline_mode<synchronous>, transform_indices = @transform_8, window_bounds = array<i64: 4, 1, 8>}, {pipeline_mode = #tpu.pipeline_mode<synchronous>, transform_indices = @transform_9, window_bounds = array<i64: 4, 8, 128>}, {pipeline_mode = #tpu.pipeline_mode<synchronous>, transform_indices = @transform_10, window_bounds = array<i64: 1, 128>}, {transform_indices = @transform_11, window_bounds = array<i64: 1, 8, 128>}, {transform_indices = @transform_12, window_bounds = array<i64: 1, 1, 8, 8>}]} {
    %c0 = arith.constant 0 : index
    %c0_0 = arith.constant 0 : index
    %c0_1 = arith.constant 0 : index
    %0 = vector.load %arg3[%c0, %c0_0, %c0_1] : memref<1x8x32xf32, #tpu.memory_space<vmem>>, vector<1x8x32xf32>
    %1 = vector.shape_cast %0 : vector<1x8x32xf32> to vector<8x32xf32>
    %c0_2 = arith.constant 0 : index
    %c0_3 = arith.constant 0 : index
    %c0_4 = arith.constant 0 : index
    %2 = vector.load %arg4[%c0_2, %c0_3, %c0_4] : memref<1x8x32xf32, #tpu.memory_space<vmem>>, vector<1x8x32xf32>
    %3 = vector.shape_cast %2 : vector<1x8x32xf32> to vector<8x32xf32>
    %c0_5 = arith.constant 0 : index
    %c0_6 = arith.constant 0 : index
    %c0_7 = arith.constant 0 : index
    %4 = vector.load %arg5[%c0_5, %c0_6, %c0_7] : memref<1x8x32xf32, #tpu.memory_space<vmem>>, vector<1x8x32xf32>
    %5 = vector.shape_cast %4 : vector<1x8x32xf32> to vector<8x32xf32>
    %6 = arith.index_cast %arg2 : i32 to index
    %c0_8 = arith.constant 0 : index
    %c0_9 = arith.constant 0 : index
    %7 = vector.load %arg6[%6, %c0_8, %c0_9] : memref<4x32x8xf32, #tpu.memory_space<vmem>>, vector<1x32x8xf32>
    %8 = vector.shape_cast %7 : vector<1x32x8xf32> to vector<32x8xf32>
    %9 = arith.index_cast %arg2 : i32 to index
    %c0_10 = arith.constant 0 : index
    %c0_11 = arith.constant 0 : index
    %10 = vector.load %arg8[%9, %c0_10, %c0_11] : memref<4x32x8xf32, #tpu.memory_space<vmem>>, vector<1x32x8xf32>
    %11 = vector.shape_cast %10 : vector<1x32x8xf32> to vector<32x8xf32>
    %12 = arith.index_cast %arg2 : i32 to index
    %c0_12 = arith.constant 0 : index
    %c0_13 = arith.constant 0 : index
    %13 = vector.load %arg10[%12, %c0_12, %c0_13] : memref<4x32x8xf32, #tpu.memory_space<vmem>>, vector<1x32x8xf32>
    %14 = vector.shape_cast %13 : vector<1x32x8xf32> to vector<32x8xf32>
    %15 = arith.index_cast %arg2 : i32 to index
    %c0_14 = arith.constant 0 : index
    %c0_15 = arith.constant 0 : index
    %16 = vector.load %arg12[%15, %c0_14, %c0_15] : memref<4x8x128xf32, #tpu.memory_space<vmem>>, vector<1x8x128xf32>
    %17 = vector.shape_cast %16 : vector<1x8x128xf32> to vector<8x128xf32>
    %cst = arith.constant dense<0.000000e+00> : vector<8x8xf32>
    %18 = tpu.matmul %1, %8, %cst {dimension_numbers = #tpu.dot_dimension_numbers<[1], [0], [0], [1], [0, 0, 1, 1], [], []>} : vector<8x32xf32>, vector<32x8xf32>, vector<8x8xf32> -> vector<8x8xf32>
    %19 = arith.index_cast %arg2 : i32 to index
    %c0_16 = arith.constant 0 : index
    %c0_17 = arith.constant 0 : index
    %20 = vector.load %arg7[%19, %c0_16, %c0_17] : memref<4x1x8xf32, #tpu.memory_space<vmem>>, vector<1x1x8xf32>
    %21 = vector.shape_cast %20 : vector<1x1x8xf32> to vector<1x8xf32>
    %22 = vector.broadcast %21 : vector<1x8xf32> to vector<8x8xf32>
    %23 = arith.addf %18, %22 : vector<8x8xf32>
    %cst_18 = arith.constant dense<0.000000e+00> : vector<8x8xf32>
    %24 = tpu.matmul %3, %11, %cst_18 {dimension_numbers = #tpu.dot_dimension_numbers<[1], [0], [0], [1], [0, 0, 1, 1], [], []>} : vector<8x32xf32>, vector<32x8xf32>, vector<8x8xf32> -> vector<8x8xf32>
    %25 = arith.index_cast %arg2 : i32 to index
    %c0_19 = arith.constant 0 : index
    %c0_20 = arith.constant 0 : index
    %26 = vector.load %arg9[%25, %c0_19, %c0_20] : memref<4x1x8xf32, #tpu.memory_space<vmem>>, vector<1x1x8xf32>
    %27 = vector.shape_cast %26 : vector<1x1x8xf32> to vector<1x8xf32>
    %28 = vector.broadcast %27 : vector<1x8xf32> to vector<8x8xf32>
    %29 = arith.addf %24, %28 : vector<8x8xf32>
    %cst_21 = arith.constant dense<0.000000e+00> : vector<8x8xf32>
    %30 = tpu.matmul %5, %14, %cst_21 {dimension_numbers = #tpu.dot_dimension_numbers<[1], [0], [0], [1], [0, 0, 1, 1], [], []>} : vector<8x32xf32>, vector<32x8xf32>, vector<8x8xf32> -> vector<8x8xf32>
    %31 = arith.index_cast %arg2 : i32 to index
    %c0_22 = arith.constant 0 : index
    %c0_23 = arith.constant 0 : index
    %32 = vector.load %arg11[%31, %c0_22, %c0_23] : memref<4x1x8xf32, #tpu.memory_space<vmem>>, vector<1x1x8xf32>
    %33 = vector.shape_cast %32 : vector<1x1x8xf32> to vector<1x8xf32>
    %34 = vector.broadcast %33 : vector<1x8xf32> to vector<8x8xf32>
    %35 = arith.addf %30, %34 : vector<8x8xf32>
    "tpu.trace_start"() <{level = 10 : i32, message = "qd,kd->qk"}> : () -> ()
    %cst_24 = arith.constant dense<0.000000e+00> : vector<8x8xf32>
    %36 = tpu.matmul %23, %29, %cst_24 {dimension_numbers = #tpu.dot_dimension_numbers<[1], [1], [0], [0], [0, 0, 1, 0], [], []>} : vector<8x8xf32>, vector<8x8xf32>, vector<8x8xf32> -> vector<8x8xf32>
    "tpu.trace_stop"() : () -> ()
    %cst_25 = arith.constant 0.353553385 : f32
    %37 = vector.broadcast %cst_25 : f32 to vector<8x8xf32>
    %38 = arith.mulf %36, %37 : vector<8x8xf32>
    %cst_26 = arith.constant dense<0xFF800000> : vector<8xf32>
    %39 = vector.multi_reduction <maximumf>, %38, %cst_26 [1] : vector<8x8xf32> to vector<8xf32>
    %40 = vector.shape_cast %39 : vector<8xf32> to vector<8x1xf32>
    %41 = vector.broadcast %40 : vector<8x1xf32> to vector<8x8xf32>
    %42 = arith.subf %38, %41 : vector<8x8xf32>
    %43 = math.exp %42 : vector<8x8xf32>
    %cst_27 = arith.constant dense<0.000000e+00> : vector<8xf32>
    %44 = vector.multi_reduction <add>, %43, %cst_27 [1] : vector<8x8xf32> to vector<8xf32>
    %45 = vector.shape_cast %44 : vector<8xf32> to vector<8x1xf32>
    %46 = vector.broadcast %45 : vector<8x1xf32> to vector<8x8xf32>
    %47 = arith.divf %43, %46 : vector<8x8xf32>
    %c0_28 = arith.constant 0 : index
    %c0_29 = arith.constant 0 : index
    %c0_30 = arith.constant 0 : index
    %c0_31 = arith.constant 0 : index
    %48 = vector.load %arg15[%c0_28, %c0_29, %c0_30, %c0_31] : memref<1x1x8x8xf32, #tpu.memory_space<vmem>>, vector<1x1x8x8xf32>
    %49 = vector.shape_cast %48 : vector<1x1x8x8xf32> to vector<8x8xf32>
    %50 = vector.shape_cast %47 : vector<8x8xf32> to vector<1x1x8x8xf32>
    tpu.vector_store %arg15[%c0_28, %c0_29, %c0_30, %c0_31], %50 {strides = array<i32>} : memref<1x1x8x8xf32, #tpu.memory_space<vmem>>, vector<1x1x8x8xf32>,
    %51 = vector.broadcast %45 : vector<8x1xf32> to vector<8x8xf32>
    %52 = arith.divf %43, %51 : vector<8x8xf32>
    %cst_32 = arith.constant dense<0.000000e+00> : vector<8x8xf32>
    %53 = tpu.matmul %52, %35, %cst_32 {dimension_numbers = #tpu.dot_dimension_numbers<[1], [0], [0], [1], [0, 0, 1, 1], [], []>} : vector<8x8xf32>, vector<8x8xf32>, vector<8x8xf32> -> vector<8x8xf32>
    %cst_33 = arith.constant dense<0.000000e+00> : vector<8x128xf32>
    %54 = tpu.matmul %53, %17, %cst_33 {dimension_numbers = #tpu.dot_dimension_numbers<[1], [0], [0], [1], [0, 0, 1, 1], [], []>} : vector<8x8xf32>, vector<8x128xf32>, vector<8x128xf32> -> vector<8x128xf32>
    %c0_i32 = arith.constant 0 : i32
    %55 = arith.cmpi eq, %arg2, %c0_i32 : i32
    %56 = arith.extui %55 : i1 to i32
    %c0_i32_34 = arith.constant 0 : i32
    %57 = arith.cmpi ne, %56, %c0_i32_34 : i32
    scf.if %57 {
      %cst_42 = arith.constant 0.000000e+00 : f32
      %67 = vector.broadcast %cst_42 : f32 to vector<1x8x128xf32>
      %c0_43 = arith.constant 0 : index
      %c0_44 = arith.constant 0 : index
      %c0_45 = arith.constant 0 : index
      %68 = vector.load %arg14[%c0_43, %c0_44, %c0_45] : memref<1x8x128xf32, #tpu.memory_space<vmem>>, vector<1x8x128xf32>
      tpu.vector_store %arg14[%c0_43, %c0_44, %c0_45], %67 {strides = array<i32>} : memref<1x8x128xf32, #tpu.memory_space<vmem>>, vector<1x8x128xf32>,
    } else {
    }
    %c0_35 = arith.constant 0 : index
    %c0_36 = arith.constant 0 : index
    %c0_37 = arith.constant 0 : index
    %58 = vector.load %arg14[%c0_35, %c0_36, %c0_37] : memref<1x8x128xf32, #tpu.memory_space<vmem>>, vector<1x8x128xf32>
    %59 = vector.shape_cast %58 : vector<1x8x128xf32> to vector<8x128xf32>
    %60 = arith.addf %59, %54 : vector<8x128xf32>
    %c0_38 = arith.constant 0 : index
    %c0_39 = arith.constant 0 : index
    %c0_40 = arith.constant 0 : index
    %61 = vector.load %arg14[%c0_38, %c0_39, %c0_40] : memref<1x8x128xf32, #tpu.memory_space<vmem>>, vector<1x8x128xf32>
    %62 = vector.shape_cast %61 : vector<1x8x128xf32> to vector<8x128xf32>
    %63 = vector.shape_cast %60 : vector<8x128xf32> to vector<1x8x128xf32>
    tpu.vector_store %arg14[%c0_38, %c0_39, %c0_40], %63 {strides = array<i32>} : memref<1x8x128xf32, #tpu.memory_space<vmem>>, vector<1x8x128xf32>,
    %c3_i32 = arith.constant 3 : i32
    %64 = arith.cmpi eq, %arg2, %c3_i32 : i32
    %65 = arith.extui %64 : i1 to i32
    %c0_i32_41 = arith.constant 0 : i32
    %66 = arith.cmpi ne, %65, %c0_i32_41 : i32
    scf.if %66 {
      %c0_42 = arith.constant 0 : index
      %c0_43 = arith.constant 0 : index
      %c0_44 = arith.constant 0 : index
      %67 = vector.load %arg14[%c0_42, %c0_43, %c0_44] : memref<1x8x128xf32, #tpu.memory_space<vmem>>, vector<1x8x128xf32>
      %68 = vector.shape_cast %67 : vector<1x8x128xf32> to vector<8x128xf32>
      %c0_45 = arith.constant 0 : index
      %c0_46 = arith.constant 0 : index
      %69 = vector.load %arg13[%c0_45, %c0_46] : memref<1x128xf32, #tpu.memory_space<vmem>>, vector<1x128xf32>
      %70 = vector.broadcast %69 : vector<1x128xf32> to vector<8x128xf32>
      %71 = arith.addf %68, %70 : vector<8x128xf32>
      %c0_47 = arith.constant 0 : index
      %c0_48 = arith.constant 0 : index
      %c0_49 = arith.constant 0 : index
      %72 = vector.load %arg14[%c0_47, %c0_48, %c0_49] : memref<1x8x128xf32, #tpu.memory_space<vmem>>, vector<1x8x128xf32>
      %73 = vector.shape_cast %72 : vector<1x8x128xf32> to vector<8x128xf32>
      %74 = vector.shape_cast %71 : vector<8x128xf32> to vector<1x8x128xf32>
      tpu.vector_store %arg14[%c0_47, %c0_48, %c0_49], %74 {strides = array<i32>} : memref<1x8x128xf32, #tpu.memory_space<vmem>>, vector<1x8x128xf32>,
    } else {
    }
    return
  }
  func.func @transform_0(%arg0: i32, %arg1: i32, %arg2: i32) -> (i32, i32, i32) {
    %c0_i32 = arith.constant 0 : i32
    %c0_i32_0 = arith.constant 0 : i32
    return %arg0, %arg1, %c0_i32 : i32, i32, i32
  }
  func.func @transform_1(%arg0: i32, %arg1: i32, %arg2: i32) -> (i32, i32, i32) {
    %c0_i32 = arith.constant 0 : i32
    %c0_i32_0 = arith.constant 0 : i32
    %c0_i32_1 = arith.constant 0 : i32
    return %arg0, %c0_i32, %c0_i32_0 : i32, i32, i32
  }
  func.func @transform_2(%arg0: i32, %arg1: i32, %arg2: i32) -> (i32, i32, i32) {
    %c0_i32 = arith.constant 0 : i32
    %c0_i32_0 = arith.constant 0 : i32
    %c0_i32_1 = arith.constant 0 : i32
    return %arg0, %c0_i32, %c0_i32_0 : i32, i32, i32
  }
  func.func @transform_3(%arg0: i32, %arg1: i32, %arg2: i32) -> (i32, i32, i32) {
    %c0_i32 = arith.constant 0 : i32
    %c0_i32_0 = arith.constant 0 : i32
    %c0_i32_1 = arith.constant 0 : i32
    %c0_i32_2 = arith.constant 0 : i32
    return %c0_i32, %c0_i32_0, %c0_i32_1 : i32, i32, i32
  }
  func.func @transform_4(%arg0: i32, %arg1: i32, %arg2: i32) -> (i32, i32, i32) {
    %c0_i32 = arith.constant 0 : i32
    %c0_i32_0 = arith.constant 0 : i32
    %c0_i32_1 = arith.constant 0 : i32
    %c0_i32_2 = arith.constant 0 : i32
    return %c0_i32, %c0_i32_0, %c0_i32_1 : i32, i32, i32
  }
  func.func @transform_5(%arg0: i32, %arg1: i32, %arg2: i32) -> (i32, i32, i32) {
    %c0_i32 = arith.constant 0 : i32
    %c0_i32_0 = arith.constant 0 : i32
    %c0_i32_1 = arith.constant 0 : i32
    %c0_i32_2 = arith.constant 0 : i32
    return %c0_i32, %c0_i32_0, %c0_i32_1 : i32, i32, i32
  }
  func.func @transform_6(%arg0: i32, %arg1: i32, %arg2: i32) -> (i32, i32, i32) {
    %c0_i32 = arith.constant 0 : i32
    %c0_i32_0 = arith.constant 0 : i32
    %c0_i32_1 = arith.constant 0 : i32
    %c0_i32_2 = arith.constant 0 : i32
    return %c0_i32, %c0_i32_0, %c0_i32_1 : i32, i32, i32
  }
  func.func @transform_7(%arg0: i32, %arg1: i32, %arg2: i32) -> (i32, i32, i32) {
    %c0_i32 = arith.constant 0 : i32
    %c0_i32_0 = arith.constant 0 : i32
    %c0_i32_1 = arith.constant 0 : i32
    %c0_i32_2 = arith.constant 0 : i32
    return %c0_i32, %c0_i32_0, %c0_i32_1 : i32, i32, i32
  }
  func.func @transform_8(%arg0: i32, %arg1: i32, %arg2: i32) -> (i32, i32, i32) {
    %c0_i32 = arith.constant 0 : i32
    %c0_i32_0 = arith.constant 0 : i32
    %c0_i32_1 = arith.constant 0 : i32
    %c0_i32_2 = arith.constant 0 : i32
    return %c0_i32, %c0_i32_0, %c0_i32_1 : i32, i32, i32
  }
  func.func @transform_9(%arg0: i32, %arg1: i32, %arg2: i32) -> (i32, i32, i32) {
    %c0_i32 = arith.constant 0 : i32
    %c0_i32_0 = arith.constant 0 : i32
    %c0_i32_1 = arith.constant 0 : i32
    %c0_i32_2 = arith.constant 0 : i32
    return %c0_i32, %c0_i32_0, %c0_i32_1 : i32, i32, i32
  }
  func.func @transform_10(%arg0: i32, %arg1: i32, %arg2: i32) -> (i32, i32) {
    %c0_i32 = arith.constant 0 : i32
    %c0_i32_0 = arith.constant 0 : i32
    %c0_i32_1 = arith.constant 0 : i32
    return %c0_i32, %c0_i32_0 : i32, i32
  }
  func.func @transform_11(%arg0: i32, %arg1: i32, %arg2: i32) -> (i32, i32, i32) {
    %c0_i32 = arith.constant 0 : i32
    %c0_i32_0 = arith.constant 0 : i32
    return %arg0, %arg1, %c0_i32 : i32, i32, i32
  }
  func.func @transform_12(%arg0: i32, %arg1: i32, %arg2: i32) -> (i32, i32, i32, i32) {
    %c0_i32 = arith.constant 0 : i32
    %c0_i32_0 = arith.constant 0 : i32
    return %arg2, %arg0, %arg1, %c0_i32 : i32, i32, i32, i32
  }
}

</mosaic_0001>

<bundles_post_ra>
// kernel: tpu_custom_call.1
= control target key start
LH: loop header
LB: loop body
LE: loop exit
PB: predicated region body
PF: predicated region fallthrough
CT: control target
= control target key end

     0   :  { %s1945_s0 = inlined_call_operand.vmem [shape: f32[2,8,32], index: 0, kind: input, shape index: {}]   ;;  %s1946_s1 = inlined_call_operand.vmem [shape: f32[2,8,32], index: 1, kind: input, shape index: {}]   ;;  %s1947_s2 = inlined_call_operand.vmem [shape: f32[2,8,32], index: 2, kind: input, shape index: {}]   ;;  %s1948_s3 = inlined_call_operand.vmem [shape: f32[4,32,8], index: 3, kind: input, shape index: {}]   ;;  %s1949_s4 = inlined_call_operand.vmem [shape: f32[4,1,8], index: 4, kind: input, shape index: {}]   ;;  %s1950_s5 = inlined_call_operand.vmem [shape: f32[4,32,8], index: 5, kind: input, shape index: {}]   ;;  %s1951_s6 = inlined_call_operand.vmem [shape: f32[4,1,8], index: 6, kind: input, shape index: {}]   ;;  %s1952_s7 = inlined_call_operand.vmem [shape: f32[4,32,8], index: 7, kind: input, shape index: {}]   ;;  %s1953_s8 = inlined_call_operand.vmem [shape: f32[4,1,8], index: 8, kind: input, shape index: {}]   ;;  %s1954_s9 = inlined_call_operand.vmem [shape: f32[4,8,128], index: 9, kind: input, shape index: {}]   ;;  %s1955_s10 = inlined_call_operand.vmem [shape: f32[1,128], index: 10, kind: input, shape index: {}]   ;;  %s1956_s11 = inlined_call_operand.hbm [shape: f32[2,8,128], index: 11, kind: output, shape index: {0}]   ;;  %s1957_s12 = inlined_call_operand.hbm [shape: f32[4,2,8,8], index: 12, kind: output, shape index: {1}]  }
   0x1   :  { %1970 = sst [smem:[#allocation14_spill]] %s1945_s0 }
   0x2   :  { %1971 = sst [smem:[#allocation15_spill]] %s1946_s1 }
   0x3   :  { %1972 = sst [smem:[#allocation16_spill]] %s1947_s2 }
   0x4   :  { %1973 = sst [smem:[#allocation17_spill]] %s1948_s3 }
   0x5   :  { %1974 = sst [smem:[#allocation18_spill]] %s1949_s4 }
   0x6   :  { %1975 = sst [smem:[#allocation19_spill]] %s1950_s5 }
   0x7   :  { %1976 = sst [smem:[#allocation20_spill]] %s1951_s6 }
   0x8   :  { %1977 = sst [smem:[#allocation21_spill]] %s1952_s7 }
   0x9   :  { %1978 = sst [smem:[#allocation22_spill]] %s1954_s9 }
   0xa   :  { %1979 = sst [smem:[#allocation23_spill]] %s1955_s10 }
   0xb   :  { %1980 = sst [smem:[#allocation24_spill]] %s1956_s11 }
   0xc   :  { %1981 = sst [smem:[#allocation25_spill]] %s1957_s12 }
   0xd   :  { %18 = vsyncpa [#allocation3], 0 }
   0xe   :  { %20 = vsyncpa [#allocation3 + $0x1], 0 }
   0xf   :  { %21 = vsyncpa [#allocation5], 0 }
  0x10   :  { %23 = vsyncpa [#allocation5 + $0x1], 0  ;;  %s1647_s21 = smov 0   ;;  %s1649_s22 = smov 0  }
  0x11   :  { %s1651_s23 = smov 0   ;;  %s1653_s24 = smov 0  }
  0x12   :  { %s1655_s25 = smov 0   ;;  %s1657_s26 = smov 0  }
  0x13   :  { %s1659_s27 = smov 0   ;;  %s1661_s28 = smov 0  }
  0x14   :  { %s1663_s29 = smov 0   ;;  %s1665_s30 = smov 0  }
  0x15   :  { %s1667_s13 = smov 0  }
  0x16 LB: > { %1982 = sst [smem:[#allocation8_spill]] %s1546_s24  ;;  %s1197_s14 = sadd.s32 4294967295, %s1574_s13   ;;  %s1574_s13 = sphi %s1667_s13, %s29_s13   ;;  %s1570_s30 = sphi %s1665_s30, %s2015_s30   ;;  %s1566_s29 = sphi %s1663_s29, %s2022_s29   ;;  %s1562_s28 = sphi %s1661_s28, %s2013_s28   ;;  %s1558_s27 = sphi %s1659_s27, %s2012_s27   ;;  %s1554_s26 = sphi %s1657_s26, %s2021_s26   ;;  %s1550_s25 = sphi %s1655_s25, %s2020_s25   ;;  %s1546_s24 = sphi %s1653_s24, %s2019_s24   ;;  %s1542_s23 = sphi %s1651_s23, %s2018_s23   ;;  %s1538_s22 = sphi %s1649_s22, %s2017_s22   ;;  %s1534_s21 = sphi %s1647_s21, %s2016_s21  }
  0x17   : > { %1983 = sst [smem:[#allocation9_spill]] %s1566_s29  ;;  %s1198_s15 = sadd.s32 4294967294, %s1574_s13  }
  0x18   : > { %1984 = sst [smem:[#allocation10_spill]] %s1570_s30  ;;  %s41_s16 = sadd.s32 1, %s1566_s29 }
  0x19   : > { %s48_s17 = sadd.s32 1, %s1570_s30  ;;  %p42_p0 = scmp.ge.s32.totalorder %s41_s16, 4 }
  0x1a   : > { %s305_s18 = sadd.s32 1, %s1554_s26  ;;  %p315_p1 = scmp.ne.s32.totalorder %s1554_s26, %s1550_s25 }
  0x1b   : > { %p1709_p2 = scmp.eq.s32.totalorder %s1197_s14, 7  ;;  %s2024_s16 = smov (%p42_p0, %s41_s16), 0 }
  0x1c   : > { %1986 = sst [smem:[#allocation11_spill]] %s2024_s16  ;;  %s2026_s17 = smov (!%p42_p0, %s48_s17), %s1570_s30 }
  0x1d   : > { %p1718_p3 = por %p1709_p2, %p315_p1  ;;  %p321_p4 = scmp.ne.s32.totalorder %s1550_s25, %s1546_s24 }
  0x1e   : > { %p50_p5 = scmp.ge.s32.totalorder %s2026_s17, 2  ;;  %p1724_p6 = scmp.eq.s32.totalorder %s1198_s15, 7 }
  0x1f   : > { %s1987_s20 = scalar_select %p1718_p3, 1, 0 }
  0x20   : > { %s328_s12 = ssub.s32 %s1566_s29, %s2024_s16  ;;  %s335_s11 = sadd.s32 1, %s1542_s23 }
  0x21   : > { %1988 = sst [smem:[#allocation12_spill]] %s1987_s20  ;;  %s2028_s17 = smov (%p50_p5, %s2026_s17), 0 }
  0x22   : > { %1990 = sst [smem:[#allocation13_spill]] %s2028_s17  ;;  %p1735_p7 = por %p1724_p6, %p321_p4 }
  0x23   : > { %p345_p8 = scmp.ne.s32.totalorder %s1542_s23, %s1538_s22  ;;  %s300_s24 = ssub.s32 %s1570_s30, %s2028_s17 }
  0x24   : > { %p351_p9 = scmp.ne.s32.totalorder %s1538_s22, %s1534_s21  ;;  %p303_p10 = scmp.eq.s32.totalorder %s300_s24, 0 }
  0x25   : > { %s330_s15 = sor.u32 %s328_s12, %s300_s24  ;;  %p1747_p12 = por %p345_p8, %p1709_p2 }
  0x26   : > { %p333_p11 = scmp.eq.s32.totalorder %s330_s15, 0  ;;  %p1759_p13 = por %p351_p9, %p1724_p6 }
  0x27   : > { %s1752_s16 = scalar_select %p303_p10, %s1554_s26, %s305_s18  }
  0x28   : > { %s1755_s29 = scalar_select %p333_p11, %s1542_s23, %s335_s11  }
  0x29   : > { %s1993_s9 = scalar_select %p1759_p13, 1, 0 }
  0x2a   : > { %p1201_p0 = scmp.ge.s32.totalorder %s1574_s13, 1  ;;  %p418_p1 = scmp.lt.s32.totalorder %s1574_s13, 9 }
  0x2c   : > { %p419_p4 = pnand %p1201_p0, %p418_p1 }
  0x2d   : > { %s1766_s12 = sshll.u32 (!%p419_p4), %s1558_s27, 5  ;;  %s1967_s24 = sand.u32 (!%p419_p4), 1, %s1550_s25   ;;  %v1576_v0 = vmov (!%p419_p4), 0.0|0.0   ;;  %vm1577_vm0 = vmmov (!%p419_p4), 0   ;;  %v1578_v4 = vmov (!%p419_p4), 0.0   ;;  %vm520_vm1 = vcmask (!%p419_p4), 261120  }
  0x2e   : > { %422 = sbr.rel (%p419_p4) target bundleno = 1301 (0x515), region = 64  ;;  %1304 = vmatprep.subr.bf16.mxu1 (!%p419_p4), %v1576_v0  ;;  %s1994_s5 = sld [smem:[#allocation19_spill]] (!%p419_p4)  ;;  %1298 = vmatprep.subr.bf16.mxu0 (!%p419_p4), %v1576_v0  ;;  %vm756_vm2 = vcmask (!%p419_p4), 64512  }
  0x2f   : > { %s1777_s14 = sshll.u32 (!%p419_p4), %s1967_s24, 3  ;;  %s1995_s3 = sld [smem:[#allocation17_spill]] (!%p419_p4)  ;;  %1269 = vmatprep.mubr.msk.f32.mxu1 (!%p419_p4), %vm1577_vm0, %v1578_v4  ;;  %1258 = vmatprep.mubr.msk.f32.mxu0 (!%p419_p4), %vm1577_vm0, %v1578_v4 }
  0x30   : > { %p475_p2 = scmp.lt.s32.totalorder (!%p419_p4), %s1562_s28, 1  ;;  %s1996_s1 = sld [smem:[#allocation15_spill]] (!%p419_p4) }
  0x31   : > { %s1997_s0 = sld [smem:[#allocation14_spill]] (!%p419_p4)  ;;  %s1998_s6 = sld [smem:[#allocation20_spill]] (!%p419_p4) }
  0x32   : > { %s1999_s4 = sld [smem:[#allocation18_spill]] (!%p419_p4)  ;;  %s2000_s7 = sld [smem:[#allocation21_spill]] (!%p419_p4) }
  0x33   : > { %s2001_s2 = sld [smem:[#allocation16_spill]] (!%p419_p4)  ;;  %p1219_p5 = scmp.ne.s32.totalorder (!%p419_p4), %s1558_s27, 0 }
  0x34   : > { %s499_s19 = scalar_lea.vmem (!%p419_p4), %s1994_s5, %s1766_s12 }
  0x35   : > { %v500_v1 = vld [vmem:[%s499_s19] sm:$0xff]  ;;  %v501_v2 = vld [vmem:[%s499_s19 + $0x8] sm:$0xff]  ;;  %s494_s30 = scalar_lea.vmem %s1995_s3, %s1766_s12  ;;  %v502_v3 = vld [vmem:[%s499_s19 + $0x10] sm:$0xff]  ;;  %v1579_v52 = vmov (!%p1219_p5), 0.0  }
  0x36   : > { %v1305_v5 = vpack.c.bf16 %v501_v2, %v500_v1  ;;  %v495_v6 = vld [vmem:[%s494_s30] sm:$0xff]  ;;  %v496_v7 = vld [vmem:[%s494_s30 + $0x8] sm:$0xff]  ;;  %v503_v8 = vld [vmem:[%s499_s19 + $0x18] sm:$0xff]  ;;  %s476_s17 = scalar_select %p475_p2, %s1562_s28, 1 }
  0x37   : > { %v1299_v9 = vpack.c.bf16 %v496_v7, %v495_v6  ;;  %v497_v10 = vld [vmem:[%s494_s30 + $0x10] sm:$0xff]  ;;  %v498_v11 = vld [vmem:[%s494_s30 + $0x18] sm:$0xff]  ;;  %v1308_v12 = vpack.c.bf16 %v503_v8, %v502_v3  ;;  %s594_s24 = scalar_lea.vmem %s1998_s6, %s1558_s27  ;;  %s1208_s30 = sshll.u32 %s1558_s27, 3 }
  0x38   : > { %1306 = vmatpush3.bf16.msra.mxu1 %v1305_v5  ;;  %v1302_v13 = vpack.c.bf16 %v498_v11, %v497_v10  ;;  %s1789_s11 = sshll.u32 %s476_s17, 3  ;;  %v1211_v16 = vld [vmem:[%s594_s24] ss:$0 sm:$0xff]  ;;  %s504_s18 = scalar_lea.vmem %s2000_s7, %s1766_s12 }
  0x39   : > { %1300 = vmatpush3.bf16.msra.mxu0 %v1299_v9  ;;  %1307 = vmatprep.subr.bf16.mxu1 %v1576_v0  ;;  %s485_s15 = scalar_lea.vmem %s1996_s1, %s1789_s11  ;;  %s481_s3 = scalar_lea.vmem %s1997_s0, %s1789_s11  ;;  %v505_v24 = vld [vmem:[%s504_s18] sm:$0xff]  ;;  %v506_v25 = vld [vmem:[%s504_s18 + $0x8] sm:$0xff]  ;;  %v507_v26 = vld [vmem:[%s504_s18 + $0x10] sm:$0xff] }
  0x3a   : > { %1301 = vmatprep.subr.bf16.mxu0 %v1576_v0  ;;  %v491_v14 = vld [vmem:[%s485_s15] sm:$0xff]  ;;  %v1311_v27 = vpack.c.bf16 %v506_v25, %v505_v24  ;;  %v508_v28 = vld [vmem:[%s504_s18 + $0x18] sm:$0xff]  ;;  %s489_s15 = scalar_lea.vmem %s2001_s2, %s1789_s11  ;;  %s2002_s24 = sld [smem:[#allocation22_spill]] }
  0x3b   : > { %v490_v15 = vld [vmem:[%s481_s3] sm:$0xff]  ;;  %s512_s3 = scalar_lea.vmem %s1999_s4, %s1558_s27  ;;  %v1314_v29 = vpack.c.bf16 %v508_v28, %v507_v26  ;;  %s467_s11 = scalar_lea.vmem [#allocation2], %s1777_s14 }
  0x3c   : > { %1309 = vmatpush3.bf16.msra.mxu1 %v1308_v12  ;;  %v1209_v17 = vld [vmem:[%s512_s3] ss:$0 sm:$0xff]  ;;  %s675_s3 = scalar_lea.vmem %s1953_s8, %s1558_s27  ;;  %996 = vst [vmem:[%s467_s11] sm:$0xff] (!%p1219_p5), %v1579_v52 }
  0x3d   : > { %1303 = vmatpush3.bf16.msra.mxu0 %v1302_v13  ;;  %1283 = vmatprep.subr.mxu1 %v1578_v4  ;;  %v492_v30 = vld [vmem:[%s489_s15] sm:$0xff]  ;;  %s1968_s15 = sand.u32 1, %s1538_s22  }
  0x3e   : > { %1310 = vmatprep.subr.bf16.mxu0 %v1576_v0  ;;  %v1213_v41 = vld [vmem:[%s675_s3] ss:$0 sm:$0xff]  ;;  %s1839_s0 = sshll.u32 %s1968_s15, 3 }
  0x3f   : > { %1270 = vmatmul.mubr.msk.f32.vlgmr.msra.gmra.mrb[0].mxu1 %vm520_vm1, %v491_v14  ;;  %s1969_s12 = scalar_lea.vmem [#allocation4], %s1839_s0 }
  0x40   : > { %1259 = vmatmul.mubr.msk.f32.vlgmr.msra.gmra.mrb[0].mxu0 %vm520_vm1, %v490_v15  ;;  %1285 = vmatprep.mubr.msk.f32.mxu1 %vm1577_vm0, %v1578_v4  ;;  %s510_s19 = scalar_lea.vmem %s2002_s24, %s1208_s30 }
  0x41   : > { %1280 = vmatprep.mubr.msk.f32.mxu0 %vm1577_vm0, %v1578_v4  ;;  %1312 = vmatpush3.bf16.msra.mxu0 %v1311_v27  ;;  %v511_v44 = vld [vmem:[%s510_s19] sm:$0xff] }
  0x42   : > { %1313 = vmatprep.subr.bf16.mxu0 %v1576_v0 }
  0x45   : > { %1315 = vmatpush3.bf16.msra.mxu0 %v1314_v29 }
  0x46   : > { %1293 = vmatprep.subr.mxu0 %v1578_v4 }
  0x48   : > { %1281 = vmatmul.mubr.msk.f32.vlgmr.msra.gmra.mrb[2].mxu0 %vm520_vm1, %v492_v30 }
  0x49   : > { %1295 = vmatprep.mubr.msk.f32.mxu0 %vm1577_vm0, %v1578_v4  ;;  %1294 = vmatpush3.msra.mxu0 %v511_v44 }
 0x112   : > { %v671_v18 = vpop.f32.mrb[0].mxu1 }
 0x113   : > { %v672_v19 = vadd.f32 %v1211_v16, %v671_v18  ;;  %v1271_v20 = vpop.f32.mrb[1].mxu1  ;;  %v590_v21 = vpop.f32.mrb[0].mxu0 }
 0x114   : > { %v591_v22 = vadd.f32 %v1209_v17, %v590_v21  ;;  %v1260_v23 = vpop.f32.mrb[1].mxu0 }
 0x115   : > { %1284 = vmatpush3.xpose.msk.msra.mxu1 %vm756_vm2, %v672_v19 }
 0x116   : > { %1288 = vmatprep.subr.mxu1 %v1578_v4 }
 0x118   : > { %1286 = vmatmul.mubr.msk.f32.vlgmr.msra.gmra.mrb[2].mxu1 %vm756_vm2, %v591_v22 }
 0x119   : > { %1290 = vmatprep.mubr.msk.f32.mxu1 %vm1577_vm0, %v1578_v4 }
 0x11b   : > { %v752_v40 = vpop.f32.mrb[2].mxu0 }
 0x11c   : > { %v1282_v42 = vpop.f32.mrb[3].mxu0  ;;  %v753_v43 = vadd.f32 %v1213_v41, %v752_v40 }
 0x11e   : > { %1289 = vmatpush3.msra.mxu1 %v753_v43 }
 0x1eb   : > { %v829_v31 = vpop.f32.mrb[2].mxu1 }
 0x1ec   : > { %v833_v32 = vmul.f32 0.35355338, %v829_v31  ;;  %v1287_v33 = vpop.f32.mrb[3].mxu1 }
 0x1ee   : > { %v834_v34 = vsel %vm756_vm2, %v833_v32, -inf }
 0x1ef   : > { %835 = vmax.xlane.f32.xlu0 %v834_v34 }
 0x27c   : > { %v836_v35 = vpop.xlane.xlu0 %835 }
 0x27d   : > { %v837_v36 = vsub.f32 %v833_v32, %v836_v35 }
 0x27f   : > { %v838_v37 = vmul.f32 1.442695, %v837_v36 }
 0x281   : > { %1420 = vpow2.f32 %v838_v37 }
 0x28b   : > { %v1421_v38 = vpop.eup %1420 }
 0x28c   : > { %v840_v39 = vsel %vm756_vm2, %v1421_v38, 0.0 }
 0x28d   : > { %841 = vadd.xlane.f32.xlu0 %v840_v39 }
 0x31a   : > { %v842_v45 = vpop.xlane.xlu0 %841 }
 0x31b   : > { %1422 = vrcp.f32 %v842_v45 }
 0x325   : > { %v1423_v46 = vpop.eup %1422 }
 0x326   : > { %v844_v47 = vmul.f32 %v1423_v46, %v1421_v38 }
 0x328   : > { %845 = vst.msk [vmem:[%s1969_s12] sm:$0xff] %vm756_vm2, %v844_v47  ;;  %1291 = vmatmul.mubr.msk.f32.vlgmr.msra.gmra.mrb[4].mxu1 %vm756_vm2, %v844_v47 }
 0x3fb   : > { %v915_v48 = vpop.f32.mrb[4].mxu1 }
 0x3fc   : > { %v1292_v49 = vpop.f32.mrb[5].mxu1  ;;  %1296 = vmatmul.mubr.msk.f32.vlgmr.msra.gmra.mrb[4].mxu0 %vm756_vm2, %v915_v48 }
 0x4ca   : > { %995 = sbr.rel (%p1219_p5) target bundleno = 1233 (0x4d1), region = 68 }
 0x4cf   : > { %v988_v50 = vpop.f32.mrb[4].mxu0 }
 0x4d0   : > { %v1297_v51 = vpop.f32.mrb[5].mxu0 }
 0x4d1 PF: > { %v997_v53 = vld [vmem:[%s467_s11] sm:$0xff]  ;;  %p1220_p6 = scmp.ne.s32.totalorder %s1558_s27, 3 }
 0x4d2   : > { %v998_v54 = vadd.f32 %v997_v53, %v988_v50  ;;  %s2003_s17 = sld [smem:[#allocation23_spill]] (!%p1220_p6) }
 0x4d3   : > { %1003 = sbr.rel (%p1220_p6) target bundleno = 1247 (0x4df), region = 72 }
 0x4d4   : > { %999 = vst [vmem:[%s467_s11] sm:$0xff] %v998_v54 }
 0x4d8   : > { %v1221_v56 = vld [vmem:[%s2003_s17] ss:$0 sm:$0xff] (!%p1220_p6) }
 0x4db   : > { %v1004_v55 = vld [vmem:[%s467_s11] sm:$0xff] }
 0x4dc   : > { %v1012_v57 = vadd.f32 %v1221_v56, %v1004_v55 }
 0x4de   : > { %1013 = vst [vmem:[%s467_s11] sm:$0xff] %v1012_v57 }
 0x4df PF: > { %s1224_s18 = sshll.u32 %s1562_s28, 7  ;;  %s2005_s15 = sld [smem:[#allocation24_spill]] }
 0x4e0   : > { %s1034_s1 = sshll.u32 %s467_s11, 4  ;;  %s2006_s2 = sand.u32 1, %s1550_s25   ;;  %s1035_s1 = int_to_ptr.vmem [resolvable:$true] %s1034_s1 }
 0x4e1   : > { %s1015_s4 = scalar_lea.sflag [#allocation3], %s2006_s2  ;;  %s1424_s5 = scalar_lea.vmem %s1035_s1, 128 }
 0x4e2   : > { %p1425_p8 = scmp.ne.s32.totalorder %s1035_s1, %s1424_s5  ;;  %s1580_s3 = smov [#allocation2]  }
 0x4e3   : > { %s1428_s30 = sshll.u32 %s1580_s3, 4  ;;  %s1429_s30 = int_to_ptr.vmem [resolvable:$false] %s1428_s30 }
 0x4e4   : > { %p1426_p9 = pnand %p1425_p8, %p1718_p3  ;;  %s1430_s17 = scalar_lea.vmem %s1429_s30, 256 }
 0x4e5   : > { %s1857_s12 = scalar_lea.hbm %s2005_s15, %s1224_s18  ;;  %p1431_p11 = scmp.lt.s32.totalorder %s1035_s1, %s1429_s30 }
 0x4e6   : > { %p1427_p10 = pneg %p1426_p9  ;;  %p1432_p0 = scmp.lt.s32.totalorder %s1430_s17, %s1424_s5 }
 0x4e8   : > { %p1433_p1 = por %p1432_p0, %p1431_p11 }
 0x4ea   : > { %p1434_p4 = pnand %p1433_p1, %p1427_p10 }
 0x4ec   : > { %1437 = shalt.err (!%p1434_p4)
}
 0x4ed   : > { %s1438_s2 = scalar_lea.hbm %s1857_s12, 128  ;;  %s1442_s24 = scalar_lea.hbm %s2005_s15, 256 }
 0x4ee   : > { %p1439_p2 = scmp.ne.s32.totalorder %s1857_s12, %s1438_s2  ;;  %p1443_p8 = scmp.lt.u32.totalorder %s1857_s12, %s2005_s15 }
 0x4ef   : > { %p1444_p9 = scmp.lt.u32.totalorder %s1442_s24, %s1438_s2  ;;  %p1446_p11 = scmp.lt.u32.totalorder %s1438_s2, %s1857_s12 }
 0x4f0   : > { %p1440_p5 = pnand %p1439_p2, %p1718_p3 }
 0x4f1   : > { %p1445_p10 = por %p1444_p9, %p1443_p8 }
 0x4f2   : > { %p1441_p6 = pneg %p1440_p5 }
 0x4f3   : > { %p1447_p0 = por %p1446_p11, %p1445_p10 }
 0x4f5   : > { %p1448_p1 = pnand %p1447_p0, %p1441_p6 }
 0x4f7   : > { %1451 = shalt.err (!%p1448_p1)
}
 0x4f8   : > { %1316 = dma.vmem_to_hbm [thread:$0]  (%p1718_p3), %s1035_s1, 128, %s1857_s12, %s1015_s4  }
 0x4f9   : > { %s1225_s5 = sshll.u32 %s1558_s27, 1  ;;  %s2007_s30 = scalar_lea.vmem [#allocation4], %s1839_s0 }
 0x4fa   : > { %s1050_s17 = sshll.u32 %s2007_s30, 4  ;;  %s1046_s11 = sadd.s32 %s1562_s28, %s1225_s5  ;;  %s1882_s17 = int_to_ptr.vmem [resolvable:$true] %s1050_s17 }
 0x4fb   : > { %s1226_s2 = sshll.u32 %s1046_s11, 7  ;;  %s2008_s14 = sld [smem:[#allocation25_spill]] }
 0x4fc   : > { %s2009_s3 = sand.u32 1, %s1538_s22   ;;  %s1452_s7 = scalar_lea.vmem %s1882_s17, 128 }
 0x4fd   : > { %s1020_s6 = scalar_lea.sflag [#allocation5], %s2009_s3  ;;  %p1453_p4 = scmp.ne.s32.totalorder %s1882_s17, %s1452_s7 }
 0x4fe   : > { %s1581_s0 = smov [#allocation4]  }
 0x4ff   : > { %p1454_p3 = pnand %p1453_p4, %p1747_p12  ;;  %s1456_s1 = sshll.u32 %s1581_s0, 4  ;;  %s1457_s1 = int_to_ptr.vmem [resolvable:$false] %s1456_s1 }
 0x500   : > { %s1458_s4 = scalar_lea.vmem %s1457_s1, 256  ;;  %p1459_p5 = scmp.lt.s32.totalorder %s1882_s17, %s1457_s1 }
 0x501   : > { %s1048_s19 = scalar_lea.hbm %s2008_s14, %s1226_s2  ;;  %p1455_p2 = pneg %p1454_p3 }
 0x502   : > { %p1460_p6 = scmp.lt.s32.totalorder %s1458_s4, %s1452_s7 }
 0x504   : > { %p1461_p8 = por %p1460_p6, %p1459_p5 }
 0x506   : > { %p1462_p9 = pnand %p1461_p8, %p1455_p2 }
 0x508   : > { %1465 = shalt.err (!%p1462_p9)
}
 0x509   : > { %s1466_s27 = scalar_lea.hbm %s1048_s19, 128  ;;  %s1470_s5 = scalar_lea.hbm %s2008_s14, 1024 }
 0x50a   : > { %p1467_p10 = scmp.ne.s32.totalorder %s1048_s19, %s1466_s27  ;;  %p1471_p1 = scmp.lt.u32.totalorder %s1048_s19, %s2008_s14 }
 0x50b   : > { %p1472_p4 = scmp.lt.u32.totalorder %s1470_s5, %s1466_s27  ;;  %p1474_p13 = scmp.lt.u32.totalorder %s1466_s27, %s1048_s19 }
 0x50c   : > { %p1468_p11 = pnand %p1467_p10, %p1747_p12 }
 0x50d   : > { %p1473_p3 = por %p1472_p4, %p1471_p1 }
 0x50e   : > { %p1469_p0 = pneg %p1468_p11 }
 0x50f   : > { %p1475_p5 = por %p1474_p13, %p1473_p3 }
 0x511   : > { %p1476_p2 = pnand %p1475_p5, %p1469_p0 }
 0x513   : > { %1479 = shalt.err (!%p1476_p2)
}
 0x514   : > { %1317 = dma.vmem_to_hbm [thread:$0]  (%p1747_p12), %s1882_s17, 128, %s1048_s19, %s1020_s6  }
 0x515 PF: > { %s2010_s7 = sld [smem:[#allocation8_spill]]  ;;  %p1327_p6 = scmp.ge.s32.totalorder %s1574_s13, 2 }
 0x517   : > { %p1321_p8 = pnand %p1327_p6, %p1735_p7 }
 0x51b   : > { %s1062_s2 = sand.u32 1, %s2010_s7  }
 0x51c   : > { %s1063_s18 = scalar_lea.sflag [#allocation3], %s1062_s2 }
 0x51d   : > { %1525 = dma.done.wait (!%p1321_p8), %s1063_s18, 128  }
 0x51e   : > { %1527 = vsyncadd (!%p1321_p8), %s1063_s18, 4294967168  ;;  %s1071_s24 = sand.u32 1, %s1534_s21   ;;  %p2011_p13 = scmp.ne.s32.totalorder %s1993_s9, 0 }
 0x51f   : > { %s1072_s3 = scalar_lea.sflag [#allocation5], %s1071_s24 }
 0x520   : > { %p1324_p9 = pnand %p1327_p6, %p2011_p13 }
 0x522   : > { %1529 = dma.done.wait (!%p1324_p9), %s1072_s3, 128  }
 0x523   : > { %1531 = vsyncadd (!%p1324_p9), %s1072_s3, 4294967168  ;;  %s29_s13 = sadd.s32 1, %s1574_s13   ;;  %s2012_s27 = sld [smem:[#allocation9_spill]] }
 0x524   : > { %p26_p12 = scmp.ge.s32.totalorder %s29_s13, 10   ;;  %s2013_s28 = sld [smem:[#allocation10_spill]] }
 0x525   : > { %s2014_s6 = sld [smem:[#allocation11_spill]]  ;;  %s2015_s30 = sld [smem:[#allocation13_spill]] }
 0x526   : > { %s2016_s21 = smov %s1538_s22  ;;  %s2017_s22 = smov %s1542_s23 }
 0x527   : > { %s2018_s23 = smov %s1755_s29  ;;  %s2019_s24 = smov %s1550_s25 }
 0x528   : > { %s2020_s25 = smov %s1554_s26  ;;  %s2021_s26 = smov %s1752_s16 }
 0x529   :  { %28 = sbr.rel (!%p26_p12) target bundleno = 22 (0x16), region = 137 }
 0x52b   : > { %s2022_s29 = smov %s2014_s6 }
 0x530   :  { %1077 = vsyncpa [#allocation3], 1 }
 0x531   :  { %1079 = vsyncpa [#allocation3 + $0x1], 1 }
 0x532   :  { %1080 = vsyncpa [#allocation5], 1 }
 0x533   :  { %1082 = vsyncpa [#allocation5 + $0x1], 1 }

</bundles_post_ra>
